<compile_context>
chip_gen: v7x
topology: tpu7x:2x2x1
jax: 0.10.0
libtpu: 0.0.40
codegen_flags: <defaults>
</compile_context>

<pallas_src>
import functools
import math

import jax
import jax.numpy as jnp
from jax import lax
from jax.experimental import pallas as pl
from jax.experimental.pallas import tpu as pltpu


def _wnet_loss_kernel(cls_ref, rec_ref, tgt_ref, ncut_ref, rcnt_ref, *,
                      H, W, k, TM, R8, HW, N, need_row_mask):
    g = pl.program_id(0)
    kW = k * W

    # ---- NCut gradient-regularization term --------------------------------
    # cls_ref block: (TR, H, k*W) with k maps packed side by side along lanes.
    # Read the three row-shifted slices straight from the ref (offsets fold into
    # the vld address; no full-tile temporary).
    top = cls_ref[:, 0:H - 2, :].astype(jnp.float32)
    mid = cls_ref[:, 1:H - 1, :].astype(jnp.float32)
    bot = cls_ref[:, 2:H, :].astype(jnp.float32)
    # Separable form of the two fixed 3x3 sobel cross-correlations (valid pad):
    #   vertical   [[1,0,-1]]*3                 -> column sum, lane diff at +2
    #   horizontal [[1,1,1],[0,0,0],[-1,-1,-1]] -> row diff, 3-tap lane sum
    colsum = top + mid + bot                              # (TR, H-2, kW)
    rowdiff = top - bot                                   # (TR, H-2, kW)
    vert = colsum[:, :, 0:kW - 2] - colsum[:, :, 2:kW]    # (TR, H-2, kW-2)
    horiz = (rowdiff[:, :, 0:kW - 2]
             + rowdiff[:, :, 1:kW - 1]
             + rowdiff[:, :, 2:kW])
    mag = jnp.sqrt(vert * vert + horiz * horiz)

    need_col_mask = k > 1                                  # static python bool
    if need_col_mask or need_row_mask:
        lane = lax.broadcasted_iota(jnp.int32, mag.shape, 2)
        mask = None
        if need_col_mask:
            # Drop columns whose 3-tap window would straddle two packed maps.
            mask = (lane % W) < (W - 2)
        if need_row_mask:
            # Ragged tail: maps >= N live in OOB/undefined block rows; drop them.
            valid = jnp.int32(N) - g * TM
            row = lax.broadcasted_iota(jnp.int32, mag.shape, 0)
            ok = (row * k + lane // W) < valid
            mask = ok if mask is None else (mask & ok)
        mag = jnp.where(mask, mag, 0.0)

    # Leading-dim (VPU) reduction only; the cross-lane sum over the tiny
    # (G, H-2, kW-2) partials happens in the XLA wrapper.
    ncut_ref[...] = jnp.sum(mag, axis=0, keepdims=True)

    # ---- Reconstruction term (lane-dense (TM, H*W) blocks) ------------------
    diff = rec_ref[...].astype(jnp.float32) - tgt_ref[...].astype(jnp.float32)
    d2 = diff * diff                                       # (TM, HW)
    if need_row_mask:
        valid = jnp.int32(N) - g * TM
        row2 = lax.broadcasted_iota(jnp.int32, d2.shape, 0)
        d2 = jnp.where(row2 < valid, d2, 0.0)
    # Split the leading dim (layout-preserving) and reduce over it -> (1, R8, HW).
    rcnt_ref[...] = jnp.sum(d2.reshape(-1, R8, HW), axis=0, keepdims=True)


def _vmem_caps():
    try:
        phys = int(pltpu.get_tpu_info().vmem_capacity_bytes)
    except Exception:                       # conservative (v7x-sized) fallback
        phys = 64 * 1024 * 1024
    # 64 MiB scoped limit on 128-MiB chips (v5e/v6e), 32 MiB on v7x (64 MiB/TC).
    return phys, min(64 * 1024 * 1024, phys // 2)


def _pick_tiles(N, H, W, tile_budget_bytes, per_map_bytes):
    # Lane packing factor: k whole maps side by side along lanes so each class
    # tile row is ~128 lanes wide.  k must divide N (avoids any padding copy);
    # prime N falls back to k=1 (correct, just less lane-dense).
    kmax = max(1, 128 // W) if W < 128 else 1
    k = 1
    for d in range(min(kmax, N), 0, -1):
        if N % d == 0:
            k = d
            break
    # Maps-per-step granularity: a multiple of k (whole packed rows) and of 8
    # (legal second-minor dim for the (TM, H*W) rec/tgt blocks).
    L = k * 8 // math.gcd(k, 8)
    cap = max(1, tile_budget_bytes // per_map_bytes)
    cap = min(cap, N)
    # Keep >= 4 grid steps (>= 2 per TensorCore under v7x megacore) when the
    # problem allows, else >= 2, so DMA/compute overlap and megacore exist.
    if N >= 4 * L:
        cap = min(cap, max(L, N // 4))
    elif N >= 2 * L:
        cap = min(cap, max(L, N // 2))
    if cap >= L:
        TM = (cap // L) * L
    elif L <= N:
        TM = L            # legality over VMEM preference (tiny N / huge maps)
    else:
        TM = N            # whole problem in one full-dim block
    G = -(-N // TM)       # cdiv
    return k, TM, G


def wnet_loss(pred_class, pred_recovery, target):
    # NOTE: the reference's gradient_regularization loops `for i in
    # range(softmax.shape[0])` (batch extent) over channel indices; that
    # coincides with "sobel over every (batch, channel) map" exactly when
    # B == C (the regime used here and in the demo).
    B, C, H, W = pred_class.shape
    assert pred_recovery.shape == target.shape == (B, C, H, W)
    assert H >= 3 and W >= 3
    N = B * C
    HW = H * W

    phys_vmem, vmem_limit = _vmem_caps()
    # Per-map VMEM charge: 3 f32 inputs x 2 pipeline buffers + ~10 f32 live
    # temporaries (top/mid/bot, colsum/rowdiff, vert/horiz, mag, diff, masks).
    per_map_bytes = (3 * 2 + 10) * HW * 4
    k, TM, G = _pick_tiles(N, H, W, (vmem_limit * 3) // 4, per_map_bytes)
    TR = TM // k
    kW = k * W
    R8 = 8 if TM % 8 == 0 else TM
    need_row_mask = (N % TM) != 0
    # If legality forced a bigger-than-budget tile (tiny N / huge maps), raise
    # the scoped limit instead of failing; stay well under physical VMEM.
    vmem_limit = min(phys_vmem * 7 // 8,
                     max(vmem_limit, per_map_bytes * TM + (4 << 20)))

    cls = pred_class.reshape(N, H, W)
    if k > 1:
        # Lane-pack k maps per row: (N,H,W) -> (N/k, H, k*W).  One extra XLA
        # pass over cls only, repaid by dense 128-lane vregs / DMA in the kernel.
        cls = (cls.reshape(N // k, k, H, W)
               .transpose(0, 2, 1, 3)
               .reshape(N // k, H, kW))
    rec = pred_recovery.reshape(N, HW)   # lane-dense, free reshape (no copy)
    tgt = target.reshape(N, HW)

    kernel = functools.partial(
        _wnet_loss_kernel, H=H, W=W, k=k, TM=TM, R8=R8, HW=HW, N=N,
        need_row_mask=need_row_mask)

    ncut_parts, rcnt_parts = pl.pallas_call(
        kernel,
        out_shape=(
            jax.ShapeDtypeStruct((G, H - 2, kW - 2), jnp.float32),
            jax.ShapeDtypeStruct((G, R8, HW), jnp.float32),
        ),
        grid_spec=pltpu.PrefetchScalarGridSpec(
            num_scalar_prefetch=0,
            grid=(G,),
            in_specs=[
                pl.BlockSpec((TR, H, kW), lambda g: (g, 0, 0)),
                pl.BlockSpec((TM, HW), lambda g: (g, 0)),
                pl.BlockSpec((TM, HW), lambda g: (g, 0)),
            ],
            out_specs=[
                pl.BlockSpec((1, H - 2, kW - 2), lambda g: (g, 0, 0)),
                pl.BlockSpec((1, R8, HW), lambda g: (g, 0, 0)),
            ],
        ),
        compiler_params=pltpu.CompilerParams(
            dimension_semantics=("parallel",),
            vmem_limit_bytes=vmem_limit),
    )(cls, rec, tgt)

    # Tiny final reductions (G x small blocks) run in XLA.
    ncut = jnp.sum(ncut_parts) / jnp.float32(N * (H - 2) * (W - 2))
    rcnt = jnp.sum(rcnt_parts)
    return ncut + rcnt


def _reference(pred_class, pred_recovery, target):
    x = pred_class.astype(jnp.float32)
    _, _, H, W = x.shape
    top, mid, bot = x[:, :, 0:H - 2, :], x[:, :, 1:H - 1, :], x[:, :, 2:H, :]
    vert = ((top[..., 0:W - 2] + mid[..., 0:W - 2] + bot[..., 0:W - 2])
            - (top[..., 2:W] + mid[..., 2:W] + bot[..., 2:W]))
    horiz = ((top[..., 0:W - 2] + top[..., 1:W - 1] + top[..., 2:W])
             - (bot[..., 0:W - 2] + bot[..., 1:W - 1] + bot[..., 2:W]))
    ncut = jnp.mean(jnp.sqrt(vert ** 2 + horiz ** 2))
    rcnt = jnp.sum((pred_recovery.astype(jnp.float32)
                    - target.astype(jnp.float32)) ** 2)
    return ncut + rcnt


if __name__ == "__main__":
    key = jax.random.PRNGKey(0)
    k1, k2, k3 = jax.random.split(key, 3)
    # B == C so the reference code's loop-over-shape[0]-indexing-channels quirk
    # coincides with plain per-channel sobel filtering.
    B, C, H, W = 4, 4, 16, 16
    logits = jax.random.normal(k1, (B, C, H, W), jnp.float32)
    pred_class = jax.nn.softmax(logits, axis=1)            # pred['class']
    pred_recovery = jax.random.normal(k2, (B, C, H, W), jnp.float32)
    target = jax.random.normal(k3, (B, C, H, W), jnp.float32)

    loss = jax.jit(wnet_loss)(pred_class, pred_recovery, target)
    jax.block_until_ready(loss)

    ref = _reference(pred_class, pred_recovery, target)
    assert jnp.allclose(loss, ref, rtol=5e-5, atol=1e-4), (loss, ref)
    print("KERNEL_OK")
</pallas_src>

<mosaic_0001>
module attributes {stable_mosaic.version = 11 : i64} {
  func.func @_wnet_loss_kernel(%arg0: i32, %arg1: memref<1x16x128xf32, #tpu.memory_space<vmem>>, %arg2: memref<8x256xf32, #tpu.memory_space<vmem>>, %arg3: memref<8x256xf32, #tpu.memory_space<vmem>>, %arg4: memref<1x14x126xf32, #tpu.memory_space<vmem>>, %arg5: memref<1x8x256xf32, #tpu.memory_space<vmem>>) attributes {dimension_semantics = [#tpu.dimension_semantics<parallel>], iteration_bounds = array<i64: 2>, scalar_prefetch = 0 : i64, scratch_operands = 0 : i64, tpu.core_type = #tpu.core_type<tc>, window_params = [{transform_indices = @transform_0, window_bounds = array<i64: 1, 16, 128>}, {transform_indices = @transform_1, window_bounds = array<i64: 8, 256>}, {transform_indices = @transform_2, window_bounds = array<i64: 8, 256>}, {transform_indices = @transform_3, window_bounds = array<i64: 1, 14, 126>}, {transform_indices = @transform_4, window_bounds = array<i64: 1, 8, 256>}]} {
    %c0 = arith.constant 0 : index
    %c0_0 = arith.constant 0 : index
    %c0_1 = arith.constant 0 : index
    %0 = vector.load %arg1[%c0, %c0_0, %c0_1] : memref<1x16x128xf32, #tpu.memory_space<vmem>>, vector<1x14x128xf32>
    %c0_2 = arith.constant 0 : index
    %c1 = arith.constant 1 : index
    %c0_3 = arith.constant 0 : index
    %1 = vector.load %arg1[%c0_2, %c1, %c0_3] : memref<1x16x128xf32, #tpu.memory_space<vmem>>, vector<1x14x128xf32>
    %c0_4 = arith.constant 0 : index
    %c2 = arith.constant 2 : index
    %c0_5 = arith.constant 0 : index
    %2 = vector.load %arg1[%c0_4, %c2, %c0_5] : memref<1x16x128xf32, #tpu.memory_space<vmem>>, vector<1x14x128xf32>
    %3 = arith.addf %0, %1 : vector<1x14x128xf32>
    %4 = arith.addf %3, %2 : vector<1x14x128xf32>
    %5 = arith.subf %0, %2 : vector<1x14x128xf32>
    %6 = vector.extract_strided_slice %4 {offsets = [0, 0, 0], sizes = [1, 14, 126], strides = [1, 1, 1]} : vector<1x14x128xf32> to vector<1x14x126xf32>
    %7 = vector.extract_strided_slice %4 {offsets = [0, 0, 2], sizes = [1, 14, 126], strides = [1, 1, 1]} : vector<1x14x128xf32> to vector<1x14x126xf32>
    %8 = arith.subf %6, %7 : vector<1x14x126xf32>
    %9 = vector.extract_strided_slice %5 {offsets = [0, 0, 0], sizes = [1, 14, 126], strides = [1, 1, 1]} : vector<1x14x128xf32> to vector<1x14x126xf32>
    %10 = vector.extract_strided_slice %5 {offsets = [0, 0, 1], sizes = [1, 14, 126], strides = [1, 1, 1]} : vector<1x14x128xf32> to vector<1x14x126xf32>
    %11 = arith.addf %9, %10 : vector<1x14x126xf32>
    %12 = vector.extract_strided_slice %5 {offsets = [0, 0, 2], sizes = [1, 14, 126], strides = [1, 1, 1]} : vector<1x14x128xf32> to vector<1x14x126xf32>
    %13 = arith.addf %11, %12 : vector<1x14x126xf32>
    %14 = arith.mulf %8, %8 : vector<1x14x126xf32>
    %15 = arith.mulf %13, %13 : vector<1x14x126xf32>
    %16 = arith.addf %14, %15 : vector<1x14x126xf32>
    %17 = math.sqrt %16 : vector<1x14x126xf32>
    %18 = tpu.iota {dimensions = array<i32: 2>} : vector<1x14x126xi32>
    %c16_i32 = arith.constant 16 : i32
    %c0_i32 = arith.constant 0 : i32
    %19 = arith.cmpi eq, %c16_i32, %c0_i32 : i32
    %c1_i32 = arith.constant 1 : i32
    %20 = arith.select %19, %c1_i32, %c16_i32 : i32
    %21 = vector.broadcast %20 : i32 to vector<1x14x126xi32>
    %22 = arith.remsi %18, %21 : vector<1x14x126xi32>
    %c0_i32_6 = arith.constant 0 : i32
    %23 = vector.broadcast %c0_i32_6 : i32 to vector<1x14x126xi32>
    %24 = arith.cmpi ne, %22, %23 : vector<1x14x126xi32>
    %c0_i32_7 = arith.constant 0 : i32
    %25 = vector.broadcast %c0_i32_7 : i32 to vector<1x14x126xi32>
    %26 = arith.cmpi slt, %22, %25 : vector<1x14x126xi32>
    %c0_i32_8 = arith.constant 0 : i32
    %27 = arith.cmpi slt, %20, %c0_i32_8 : i32
    %28 = vector.broadcast %27 : i1 to vector<1x14x126xi1>
    %29 = vector.broadcast %28 : vector<1x14x126xi1> to vector<1x14x126xi1>
    %30 = arith.xori %26, %29 : vector<1x14x126xi1>
    %31 = arith.andi %30, %24 : vector<1x14x126xi1>
    %32 = vector.broadcast %20 : i32 to vector<1x14x126xi32>
    %33 = arith.addi %22, %32 : vector<1x14x126xi32>
    %34 = arith.select %31, %33, %22 : vector<1x14x126xi1>, vector<1x14x126xi32>
    %c14_i32 = arith.constant 14 : i32
    %35 = vector.broadcast %c14_i32 : i32 to vector<1x14x126xi32>
    %36 = arith.cmpi slt, %34, %35 : vector<1x14x126xi32>
    %cst = arith.constant 0.000000e+00 : f32
    %37 = vector.broadcast %cst : f32 to vector<1x14x126xf32>
    %38 = arith.select %36, %17, %37 : vector<1x14x126xi1>, vector<1x14x126xf32>
    %cst_9 = arith.constant dense<0.000000e+00> : vector<14x126xf32>
    %39 = vector.multi_reduction <add>, %38, %cst_9 [0] : vector<1x14x126xf32> to vector<14x126xf32>
    %40 = vector.shape_cast %39 : vector<14x126xf32> to vector<1x14x126xf32>
    %c0_10 = arith.constant 0 : index
    %c0_11 = arith.constant 0 : index
    %c0_12 = arith.constant 0 : index
    %41 = vector.load %arg4[%c0_10, %c0_11, %c0_12] : memref<1x14x126xf32, #tpu.memory_space<vmem>>, vector<1x14x126xf32>
    tpu.vector_store %arg4[%c0_10, %c0_11, %c0_12], %40 {strides = array<i32>} : memref<1x14x126xf32, #tpu.memory_space<vmem>>, vector<1x14x126xf32>,
    %c0_13 = arith.constant 0 : index
    %c0_14 = arith.constant 0 : index
    %42 = vector.load %arg2[%c0_13, %c0_14] : memref<8x256xf32, #tpu.memory_space<vmem>>, vector<8x256xf32>
    %c0_15 = arith.constant 0 : index
    %c0_16 = arith.constant 0 : index
    %43 = vector.load %arg3[%c0_15, %c0_16] : memref<8x256xf32, #tpu.memory_space<vmem>>, vector<8x256xf32>
    %44 = arith.subf %42, %43 : vector<8x256xf32>
    %45 = arith.mulf %44, %44 : vector<8x256xf32>
    %46 = vector.shape_cast %45 : vector<8x256xf32> to vector<1x8x256xf32>
    %cst_17 = arith.constant dense<0.000000e+00> : vector<8x256xf32>
    %47 = vector.multi_reduction <add>, %46, %cst_17 [0] : vector<1x8x256xf32> to vector<8x256xf32>
    %48 = vector.shape_cast %47 : vector<8x256xf32> to vector<1x8x256xf32>
    %c0_18 = arith.constant 0 : index
    %c0_19 = arith.constant 0 : index
    %c0_20 = arith.constant 0 : index
    %49 = vector.load %arg5[%c0_18, %c0_19, %c0_20] : memref<1x8x256xf32, #tpu.memory_space<vmem>>, vector<1x8x256xf32>
    tpu.vector_store %arg5[%c0_18, %c0_19, %c0_20], %48 {strides = array<i32>} : memref<1x8x256xf32, #tpu.memory_space<vmem>>, vector<1x8x256xf32>,
    return
  }
  func.func @transform_0(%arg0: i32) -> (i32, i32, i32) {
    %c0_i32 = arith.constant 0 : i32
    %c0_i32_0 = arith.constant 0 : i32
    %c0_i32_1 = arith.constant 0 : i32
    return %arg0, %c0_i32, %c0_i32_0 : i32, i32, i32
  }
  func.func @transform_1(%arg0: i32) -> (i32, i32) {
    %c0_i32 = arith.constant 0 : i32
    %c0_i32_0 = arith.constant 0 : i32
    return %arg0, %c0_i32 : i32, i32
  }
  func.func @transform_2(%arg0: i32) -> (i32, i32) {
    %c0_i32 = arith.constant 0 : i32
    %c0_i32_0 = arith.constant 0 : i32
    return %arg0, %c0_i32 : i32, i32
  }
  func.func @transform_3(%arg0: i32) -> (i32, i32, i32) {
    %c0_i32 = arith.constant 0 : i32
    %c0_i32_0 = arith.constant 0 : i32
    %c0_i32_1 = arith.constant 0 : i32
    return %arg0, %c0_i32, %c0_i32_0 : i32, i32, i32
  }
  func.func @transform_4(%arg0: i32) -> (i32, i32, i32) {
    %c0_i32 = arith.constant 0 : i32
    %c0_i32_0 = arith.constant 0 : i32
    %c0_i32_1 = arith.constant 0 : i32
    return %arg0, %c0_i32, %c0_i32_0 : i32, i32, i32
  }
}

</mosaic_0001>

<bundles_post_ra>
// kernel: wnet_loss.1
= control target key start
LH: loop header
LB: loop body
LE: loop exit
PB: predicated region body
PF: predicated region fallthrough
CT: control target
= control target key end

     0   :  { %s529_s15 = smov 0   ;;  %s570_s0 = inlined_call_operand.vmem [shape: f32[2,16,128], index: 0, kind: input, shape index: {}]   ;;  %s571_s1 = inlined_call_operand.vmem [shape: f32[16,256], index: 1, kind: input, shape index: {}]   ;;  %s572_s2 = inlined_call_operand.vmem [shape: f32[16,256], index: 2, kind: input, shape index: {}]   ;;  %s573_s3 = inlined_call_operand.vmem [shape: f32[2,14,126], index: 3, kind: output, shape index: {0}]   ;;  %s574_s4 = inlined_call_operand.vmem [shape: f32[2,8,256], index: 4, kind: output, shape index: {1}]  }
   0x1 LB: > { %s458_s16 = sadd.s32 4294967295, %s500_s15   ;;  %p462_p0 = scmp.ge.s32.totalorder %s500_s15, 1  ;;  %s500_s15 = sphi %s529_s15, %s15_s15  }
   0x2   : > { %p185_p1 = scmp.lt.s32.totalorder %s500_s15, 3 }
   0x4   : > { %p186_p2 = pnand %p462_p0, %p185_p1 }
   0x5   : > { %p226_p3 = scmp.lt.s32.totalorder (!%p186_p2), %s458_s16, 1  ;;  %s502_s30 = smov (!%p186_p2), 127   ;;  %v311_v35 = vlaneseq (!%p186_p2)  ;;  %vm330_vm2 = vcmask (!%p186_p2), 1031168   ;;  %vm332_vm5 = vcmask (!%p186_p2), 1029120  }
   0x6   : > { %189 = sbr.rel (%p186_p2) target bundleno = 171 (0xab), region = 32  ;;  %s503_s5 = smov (!%p186_p2), 126  }
   0x7   : > { %v312_v39 = vand.u32 (!%p186_p2), 127, %v311_v35 }
   0x9   : > { %v317_v40 = vand.u32 (!%p186_p2), 15, %v312_v39 }
   0xb   : > { %vm555_vm0 = vcmp.lt.s32.totalorder (!%p186_p2), %v317_v40, 14 }
   0xd   : > { %s578_s16 = smov (!%p226_p3, %s458_s16), 1 }
   0xe   : > { %s537_s17 = sshll.u32 %s578_s16, 4 }
   0xf   : > { %s230_s20 = scalar_lea.vmem %s570_s0, %s537_s17  ;;  %s235_s23 = scalar_lea.vmem %s571_s1, %s537_s17 }
  0x10   : > { %s240_s26 = scalar_lea.vmem %s572_s2, %s537_s17  ;;  %v251_v0 = vld [vmem:[%s230_s20] sm:$0xff]  ;;  %v335_v4 = vld [vmem:[%s235_s23 + $0x8] sm:$0xff]  ;;  %s250_s29 = scalar_lea.vmem %s574_s4, %s537_s17 }
  0x11   : > { %v255_v1 = vld [vmem:[%s230_s20 + $0x2] sm:$0xff]  ;;  %v256_v11 = vld [vmem:[%s230_s20 + $0xa] sm:$0x3f]  ;;  %s245_s8 = scalar_lea.vmem %s573_s3, %s537_s17 }
  0x12   : > { %v334_v2 = vld [vmem:[%s235_s23] sm:$0xff]  ;;  %v261_v3 = vsub.f32 %v251_v0, %v255_v1  ;;  %v337_v6 = vld [vmem:[%s240_s26 + $0x8] sm:$0xff] }
  0x13   : > { %v336_v5 = vld [vmem:[%s240_s26] sm:$0xff]  ;;  %v339_v8 = vsub.f32 %v335_v4, %v337_v6  ;;  %v252_v10 = vld [vmem:[%s230_s20 + $0x8] sm:$0x3f] }
  0x14   : > { %v338_v7 = vsub.f32 %v334_v2, %v336_v5  ;;  %v253_v9 = vld [vmem:[%s230_s20 + $0x1] sm:$0xff]  ;;  %275 = vrot.lane.b32.xlu0 %v261_v3, %s502_s30  ;;  %v262_v13 = vsub.f32 %v252_v10, %v256_v11  ;;  %v254_v14 = vld [vmem:[%s230_s20 + $0x9] sm:$0x3f] }
  0x15   : > { %v257_v12 = vadd.f32 %v253_v9, %v251_v0  ;;  %v341_v16 = vmul.f32 %v339_v8, %v339_v8  ;;  %v258_v17 = vadd.f32 %v254_v14, %v252_v10 }
  0x16   : > { %v340_v15 = vmul.f32 %v338_v7, %v338_v7 }
  0x17   : > { %v259_v18 = vadd.f32 %v257_v12, %v255_v1  ;;  %345 = vst [vmem:[%s250_s29 + $0x8] sm:$0xff] %v341_v16  ;;  %v260_v19 = vadd.f32 %v258_v17, %v256_v11 }
  0x18   : > { %344 = vst [vmem:[%s250_s29] sm:$0xff] %v340_v15  ;;  %277 = vrot.lane.b32.xlu0 %v262_v13, %s502_s30 }
  0x19   : > { %265 = vrot.lane.b32.xlu1 %v259_v18, %s503_s5 }
  0x1c   : > { %283 = vrot.lane.b32.xlu0 %v261_v3, %s503_s5 }
  0x1d   : > { %267 = vrot.lane.b32.xlu1 %v260_v19, %s503_s5 }
  0x21   : > { %285 = vrot.lane.b32.xlu1 %v262_v13, %s503_s5 }
  0x86   : > { %v276_v20 = vpop.permute.xlu0 %275 }
  0x87   : > { %v281_v23 = vadd.f32 %v276_v20, %v261_v3 }
  0x8a   : > { %v278_v22 = vpop.permute.xlu0 %277 }
  0x8b   : > { %v266_v21 = vpop.permute.xlu1 %265  ;;  %v282_v29 = vadd.f32 %v278_v22, %v262_v13 }
  0x8c   : > { %v271_v24 = vsub.f32 %v259_v18, %v266_v21 }
  0x8e   : > { %v284_v26 = vpop.permute.xlu0 %283  ;;  %v291_v28 = vmul.f32 %v271_v24, %v271_v24 }
  0x8f   : > { %v268_v25 = vpop.permute.xlu1 %267  ;;  %v289_v27 = vadd.f32 %v284_v26, %v281_v23 }
  0x90   : > { %v272_v31 = vsub.f32 %v260_v19, %v268_v25 }
  0x91   : > { %v293_v30 = vmul.f32 %v289_v27, %v289_v27 }
  0x92   : > { %v292_v36 = vmul.f32 %v272_v31, %v272_v31 }
  0x93   : > { %v286_v32 = vpop.permute.xlu1 %285  ;;  %v295_v33 = vadd.f32 %v293_v30, %v291_v28 }
  0x94   : > { %v290_v34 = vadd.f32 %v286_v32, %v282_v29 }
  0x95   : > { %490 = vrsqrt.f32 %v295_v33  ;;  %vm299_vm1 = vcmp.eq.f32.partialorder %v295_v33, inf  ;;  %v302_v44 = vand.u32 2147483648, %v295_v33  ;;  %vm301_vm3 = vcmp.eq.f32.partialorder %v295_v33, 0.0 }
  0x96   : > { %v294_v37 = vmul.f32 %v290_v34, %v290_v34 }
  0x98   : > { %v296_v38 = vadd.f32 %v294_v37, %v292_v36 }
  0x9a   : > { %492 = vrsqrt.f32 %v296_v38  ;;  %vm306_vm4 = vcmp.eq.f32.partialorder %v296_v38, inf  ;;  %v309_v50 = vand.u32 2147483648, %v296_v38  ;;  %vm308_vm6 = vcmp.eq.f32.partialorder %v296_v38, 0.0 }
  0x9f   : > { %v491_v41 = vpop.eup %490 }
  0xa0   : > { %v298_v42 = vmul.f32 %v491_v41, %v295_v33 }
  0xa2   : > { %v300_v45 = vsel %vm299_vm1, %v295_v33, %v298_v42 }
  0xa3   : > { %v303_v46 = vsel %vm301_vm3, %v302_v44, %v300_v45 }
  0xa4   : > { %v493_v47 = vpop.eup %492  ;;  %v326_v48 = vsel %vm555_vm0, %v303_v46, 0.0 }
  0xa5   : > { %331 = vst.msk [vmem:[%s245_s8] sm:$0xff] %vm330_vm2, %v326_v48  ;;  %v305_v49 = vmul.f32 %v493_v47, %v296_v38 }
  0xa7   : > { %v307_v51 = vsel %vm306_vm4, %v296_v38, %v305_v49 }
  0xa8   : > { %v310_v52 = vsel %vm308_vm6, %v309_v50, %v307_v51 }
  0xa9   : > { %v327_v53 = vsel %vm555_vm0, %v310_v52, 0.0 }
  0xaa   : > { %333 = vst.msk [vmem:[%s245_s8 + $0x8] sm:$0x3f] %vm332_vm5, %v327_v53 }
  0xab PF: > { %s15_s15 = sadd.s32 1, %s500_s15  }
  0xac   : > { %p12_p4 = scmp.ge.s32.totalorder %s15_s15, 4  }
  0xae   :  { %14 = sbr.rel (!%p12_p4) target bundleno = 1 (0x1), region = 80 }

</bundles_post_ra>
